<compile_context>
chip_gen: v6e
topology: v6e:2x2x1
jax: 0.10.0
libtpu: 0.0.40
codegen_flags: <defaults>
</compile_context>

<pallas_src>
import jax
import jax.numpy as jnp
from jax.experimental import pallas as pl
from jax.experimental.pallas import tpu as pltpu

EPS = 1e-5  # InstanceNorm3d default eps


def _round_up(v, m):
    return ((v + m - 1) // m) * m


def _vmem_budget_bytes():
    """Generation-aware scoped-VMEM budget (~5/8 of physical VMEM)."""
    cap = 64 * 1024 * 1024  # conservative fallback (v7x-sized VMEM)
    try:
        info = pltpu.get_tpu_info()
        cap = int(getattr(info, "vmem_capacity_bytes", cap)) or cap
    except Exception:
        pass
    budget = min((cap * 5) // 8, cap - 16 * 1024 * 1024)
    return max(budget, 16 * 1024 * 1024)


def _bytes_per_lane(Ci1, Ci2, Cint, in_bytes, out_bytes):
    """Conservative VMEM bytes needed per spatial lane of one grid step."""
    Cc = Ci1 + Ci2
    return (2 * Cc * in_bytes      # double-buffered x / up input tiles
            + 2 * out_bytes        # double-buffered output tile
            + Cc * 4               # f32 upcast of the input tiles
            + 3 * Cint * 4         # folded-conv output / ReLU / temporaries
            + 2 * 4)               # psi / sigmoid rows


def _spatial_tile(S, ts_cap):
    """Multiple-of-128 spatial tile <= ts_cap; prefers an exact divisor of S."""
    ts_cap = max(128, (ts_cap // 128) * 128)
    s128 = _round_up(S, 128)
    if s128 <= ts_cap:
        return s128
    t = ts_cap
    while t >= max(128, ts_cap // 2):
        if S % t == 0:
            return t
        t -= 128
    # TODO(synk): mask the ragged last tile in-kernel (broadcasted_iota)
    # instead of zero-padding the inputs (padding costs one extra HBM copy).
    return ts_cap


def spatial_attention_3d(x, up, params, *, max_tile_lanes=None):
    """x: (N, Ci1, D, H, W), up: (N, Ci2, D, H, W) -> (N, 1, D, H, W)."""
    wx, bx, wg, bg, wp, bp = params  # bx, bg cancel under InstanceNorm -> unused in kernels
    N, Ci1, D, H, W = x.shape
    Ci2 = up.shape[1]
    Cint = wx.shape[0]
    Cc = Ci1 + Ci2
    S = D * H * W
    inv_S = 1.0 / float(S)

    in_bytes = jnp.dtype(x.dtype).itemsize
    budget = _vmem_budget_bytes()
    bpl = _bytes_per_lane(Ci1, Ci2, Cint, in_bytes, in_bytes)
    lane_cap = 32 * 1024 if budget <= 48 * 1024 * 1024 else 64 * 1024
    ts_cap = max(128, min(budget // bpl, lane_cap))
    if max_tile_lanes is not None:  # test / tuning override
        ts_cap = max(128, (int(max_tile_lanes) // 128) * 128)
    TS = _spatial_tile(S, ts_cap)
    S_pad = _round_up(S, TS)
    n_s = S_pad // TS

    xf = x.reshape(N, Ci1, S)
    upf = up.reshape(N, Ci2, S)
    if S_pad != S:
        xf = jnp.pad(xf, ((0, 0), (0, 0), (0, S_pad - S)))
        upf = jnp.pad(upf, ((0, 0), (0, 0), (0, S_pad - S)))

    wx_f = wx.astype(jnp.float32)                       # (Cint, Ci1)
    wg_f = wg.astype(jnp.float32)                       # (Cint, Ci2)
    wp_col = wp.reshape(Cint, 1).astype(jnp.float32)    # (Cint, 1)
    bp_11 = bp.reshape(1, 1).astype(jnp.float32)        # (1, 1)

    dn = (((1,), (1,)), ((), ()))  # contract the lane (spatial) axis of both operands

    if n_s == 1:
        # ----------------- fused single-pass kernel: x/up read from HBM once -----------------
        # TODO(synk): for N == 1 on v7x this single "parallel" axis does not shard across the
        # 2 TensorCores; a core-parallel S split with a partial-stat combine would recover it.
        def fused_kernel(x_ref, up_ref, wx_ref, wg_ref, wp_ref, bp_ref, o_ref):
            xt = x_ref[0].astype(jnp.float32)    # (Ci1, S_pad)
            ut = up_ref[0].astype(jnp.float32)   # (Ci2, S_pad)
            wxk = wx_ref[...]                    # (Cint, Ci1)
            wgk = wg_ref[...]                    # (Cint, Ci2)

            # Input sufficient statistics (Gram + sums); the 1x1x1-conv output
            # statistics follow without materializing any (Cint, S) tensor twice.
            gx = jax.lax.dot_general(xt, xt, dn, preferred_element_type=jnp.float32)  # (Ci1, Ci1)
            gu = jax.lax.dot_general(ut, ut, dn, preferred_element_type=jnp.float32)  # (Ci2, Ci2)
            sx = jnp.sum(xt, axis=-1, keepdims=True)    # (Ci1, 1)
            su = jnp.sum(ut, axis=-1, keepdims=True)    # (Ci2, 1)

            tx = jnp.dot(wxk, jnp.concatenate([sx, gx], axis=1),
                         preferred_element_type=jnp.float32)          # (Cint, 1+Ci1)
            tu = jnp.dot(wgk, jnp.concatenate([su, gu], axis=1),
                         preferred_element_type=jnp.float32)          # (Cint, 1+Ci2)
            mean_x = tx[:, :1] * inv_S                                 # (Cint, 1)
            mean_g = tu[:, :1] * inv_S
            ex2_x = jnp.sum(tx[:, 1:] * wxk, axis=-1, keepdims=True) * inv_S
            ex2_g = jnp.sum(tu[:, 1:] * wgk, axis=-1, keepdims=True) * inv_S
            # NOTE: single-pass E[u^2]-mean^2 (clamped >= 0); adequate at IN scales.
            rstd_x = jax.lax.rsqrt(jnp.maximum(ex2_x - mean_x * mean_x, 0.0) + EPS)
            rstd_g = jax.lax.rsqrt(jnp.maximum(ex2_g - mean_g * mean_g, 0.0) + EPS)

            # InstanceNorm folded into the convs: fused linear map + bias, then ReLU,
            # 1-channel projection on the VPU (cross-sublane add), sigmoid, dense store.
            h = (jnp.dot(rstd_x * wxk, xt, preferred_element_type=jnp.float32)
                 + jnp.dot(rstd_g * wgk, ut, preferred_element_type=jnp.float32)
                 - (mean_x * rstd_x + mean_g * rstd_g))
            t = jnp.maximum(h, 0.0)
            psi = jnp.sum(t * wp_ref[...], axis=0, keepdims=True) + bp_ref[...]
            o_ref[0] = jax.nn.sigmoid(psi).astype(o_ref.dtype)

        out = pl.pallas_call(
            fused_kernel,
            out_shape=jax.ShapeDtypeStruct((N, 1, S_pad), x.dtype),
            grid_spec=pltpu.PrefetchScalarGridSpec(
                num_scalar_prefetch=0,
                grid=(N,),
                in_specs=[
                    pl.BlockSpec((1, Ci1, S_pad), lambda n: (n, 0, 0)),
                    pl.BlockSpec((1, Ci2, S_pad), lambda n: (n, 0, 0)),
                    pl.BlockSpec((Cint, Ci1), lambda n: (0, 0)),
                    pl.BlockSpec((Cint, Ci2), lambda n: (0, 0)),
                    pl.BlockSpec((Cint, 1), lambda n: (0, 0)),
                    pl.BlockSpec((1, 1), lambda n: (0, 0)),
                ],
                out_specs=pl.BlockSpec((1, 1, S_pad), lambda n: (n, 0, 0)),
            ),
            compiler_params=pltpu.CompilerParams(
                dimension_semantics=("parallel",),
                vmem_limit_bytes=budget),
        )(xf, upf, wx_f, wg_f, wp_col, bp_11)

    else:
        # ----------------- pass 1: input sufficient statistics (sums + Grams) -----------------
        NSPLIT = 2 if (n_s % 2 == 0 and n_s >= 2) else 1   # megacore coverage even for N == 1
        n_s_inner = n_s // NSPLIT

        def stats_kernel(x_ref, up_ref, stx_ref, stu_ref):
            s = pl.program_id(2)
            xt = x_ref[0].astype(jnp.float32)    # (Ci1, TS)
            ut = up_ref[0].astype(jnp.float32)   # (Ci2, TS)
            gx = jax.lax.dot_general(xt, xt, dn, preferred_element_type=jnp.float32)
            gu = jax.lax.dot_general(ut, ut, dn, preferred_element_type=jnp.float32)
            sx = jnp.sum(xt, axis=-1, keepdims=True)
            su = jnp.sum(ut, axis=-1, keepdims=True)
            cx = jnp.concatenate([sx, gx], axis=1)   # (Ci1, Ci1+1): [sum | Gram]
            cu = jnp.concatenate([su, gu], axis=1)   # (Ci2, Ci2+1)

            @pl.when(s == 0)
            def _():
                stx_ref[...] = jnp.zeros_like(stx_ref)
                stu_ref[...] = jnp.zeros_like(stu_ref)

            stx_ref[0, 0] += cx
            stu_ref[0, 0] += cu

        stat_x, stat_u = pl.pallas_call(
            stats_kernel,
            out_shape=(jax.ShapeDtypeStruct((N, NSPLIT, Ci1, Ci1 + 1), jnp.float32),
                       jax.ShapeDtypeStruct((N, NSPLIT, Ci2, Ci2 + 1), jnp.float32)),
            grid_spec=pltpu.PrefetchScalarGridSpec(
                num_scalar_prefetch=0,
                grid=(N, NSPLIT, n_s_inner),
                in_specs=[
                    pl.BlockSpec((1, Ci1, TS), lambda n, p, s: (n, 0, p * n_s_inner + s)),
                    pl.BlockSpec((1, Ci2, TS), lambda n, p, s: (n, 0, p * n_s_inner + s)),
                ],
                out_specs=[
                    pl.BlockSpec((1, 1, Ci1, Ci1 + 1), lambda n, p, s: (n, p, 0, 0)),
                    pl.BlockSpec((1, 1, Ci2, Ci2 + 1), lambda n, p, s: (n, p, 0, 0)),
                ],
            ),
            compiler_params=pltpu.CompilerParams(
                dimension_semantics=("parallel", "parallel", "arbitrary"),
                vmem_limit_bytes=budget),
        )(xf, upf)

        # -------- tiny JAX finalize: conv-output stats + fold InstanceNorm into the conv --------
        hp = jax.lax.Precision.HIGHEST
        stx = stat_x.sum(axis=1)                    # (N, Ci1, Ci1+1)
        stu = stat_u.sum(axis=1)                    # (N, Ci2, Ci2+1)
        sx, gx = stx[:, :, 0], stx[:, :, 1:]
        su, gu = stu[:, :, 0], stu[:, :, 1:]
        mean_x = jnp.einsum('oc,nc->no', wx_f, sx, precision=hp) * inv_S          # (N, Cint)
        mean_g = jnp.einsum('oc,nc->no', wg_f, su, precision=hp) * inv_S
        ex2_x = jnp.einsum('oc,ncd,od->no', wx_f, gx, wx_f, precision=hp) * inv_S
        ex2_g = jnp.einsum('oc,ncd,od->no', wg_f, gu, wg_f, precision=hp) * inv_S
        rstd_x = jax.lax.rsqrt(jnp.maximum(ex2_x - mean_x * mean_x, 0.0) + EPS)
        rstd_g = jax.lax.rsqrt(jnp.maximum(ex2_g - mean_g * mean_g, 0.0) + EPS)
        fwx = rstd_x[:, :, None] * wx_f[None, :, :]                               # (N, Cint, Ci1)
        fwg = rstd_g[:, :, None] * wg_f[None, :, :]                               # (N, Cint, Ci2)
        fb = -(mean_x * rstd_x + mean_g * rstd_g)                                  # (N, Cint)
        fused_w = jnp.concatenate([fwx, fwg, fb[:, :, None]], axis=-1)            # (N, Cint, Cc+1)

        # ----------------- pass 2: folded conv, ReLU, projection, sigmoid -----------------
        def apply_kernel(fw_ref, x_ref, up_ref, wp_ref, bp_ref, o_ref):
            xt = x_ref[0].astype(jnp.float32)    # (Ci1, TS)
            ut = up_ref[0].astype(jnp.float32)   # (Ci2, TS)
            fw = fw_ref[0]                       # (Cint, Ci1+Ci2+1)
            wxf = fw[:, :Ci1]
            wgf = fw[:, Ci1:Ci1 + Ci2]
            bf = fw[:, Ci1 + Ci2:]               # (Cint, 1)
            h = (jnp.dot(wxf, xt, preferred_element_type=jnp.float32)
                 + jnp.dot(wgf, ut, preferred_element_type=jnp.float32) + bf)
            t = jnp.maximum(h, 0.0)
            psi = jnp.sum(t * wp_ref[...], axis=0, keepdims=True) + bp_ref[...]
            o_ref[0] = jax.nn.sigmoid(psi).astype(o_ref.dtype)

        out = pl.pallas_call(
            apply_kernel,
            out_shape=jax.ShapeDtypeStruct((N, 1, S_pad), x.dtype),
            grid_spec=pltpu.PrefetchScalarGridSpec(
                num_scalar_prefetch=0,
                grid=(N, n_s),
                in_specs=[
                    pl.BlockSpec((1, Cint, Cc + 1), lambda n, s: (n, 0, 0)),
                    pl.BlockSpec((1, Ci1, TS), lambda n, s: (n, 0, s)),
                    pl.BlockSpec((1, Ci2, TS), lambda n, s: (n, 0, s)),
                    pl.BlockSpec((Cint, 1), lambda n, s: (0, 0)),
                    pl.BlockSpec((1, 1), lambda n, s: (0, 0)),
                ],
                out_specs=pl.BlockSpec((1, 1, TS), lambda n, s: (n, 0, s)),
            ),
            compiler_params=pltpu.CompilerParams(
                dimension_semantics=("parallel", "parallel"),
                vmem_limit_bytes=budget),
        )(fused_w, xf, upf, wp_col, bp_11)

    if S_pad != S:
        out = out[:, :, :S]
    return out.reshape(N, 1, D, H, W)


def init_params(key, in_channel1, in_channel2, inter_channel):
    """Deterministic synthetic init. Conv3d k=1 weights stored as (Cout, Cin)."""
    k = jax.random.split(key, 6)
    wx = jax.random.normal(k[0], (inter_channel, in_channel1), jnp.float32) * 0.1
    bx = jax.random.normal(k[1], (inter_channel, 1), jnp.float32) * 0.1
    wg = jax.random.normal(k[2], (inter_channel, in_channel2), jnp.float32) * 0.1
    bg = jax.random.normal(k[3], (inter_channel, 1), jnp.float32) * 0.1
    wp = jax.random.normal(k[4], (1, inter_channel), jnp.float32) * 0.1
    bp = jax.random.normal(k[5], (1, 1), jnp.float32) * 0.1
    return (wx, bx, wg, bg, wp, bp)


def reference(x, up, params):
    """Pure-JAX reference mirroring the PyTorch forward (biases included)."""
    wx, bx, wg, bg, wp, bp = params
    N, Ci1, D, H, W = x.shape
    S = D * H * W
    xf = x.reshape(N, Ci1, S).astype(jnp.float32)
    upf = up.reshape(N, up.shape[1], S).astype(jnp.float32)

    hx = jnp.einsum('oc,ncs->nos', wx, xf) + bx[None]
    hg = jnp.einsum('oc,ncs->nos', wg, upf) + bg[None]

    def inorm(h):
        m = jnp.mean(h, axis=-1, keepdims=True)
        v = jnp.mean((h - m) ** 2, axis=-1, keepdims=True)
        return (h - m) / jnp.sqrt(v + EPS)

    t = jax.nn.relu(inorm(hx) + inorm(hg))
    psi = jnp.einsum('oc,ncs->nos', wp, t) + bp[None]
    return jax.nn.sigmoid(psi).reshape(N, 1, D, H, W)


if __name__ == "__main__":
    key = jax.random.PRNGKey(0)
    k_x, k_up, k_p = jax.random.split(key, 3)

    N, Ci1, Ci2, Cint = 2, 4, 6, 8
    D = H = W = 8  # S = 512

    x = jax.random.normal(k_x, (N, Ci1, D, H, W), jnp.float32)
    up = jax.random.normal(k_up, (N, Ci2, D, H, W), jnp.float32)
    params = init_params(k_p, Ci1, Ci2, Cint)

    # Tolerance covers TPU matmul-pass rounding differences between the folded
    # InstanceNorm/Gram formulation in the kernels and the straightforward reference.
    ATOL = RTOL = 2e-3

    ref = jax.block_until_ready(reference(x, up, params))

    # Path A: fused single-kernel path (whole padded volume in one spatial tile).
    out = jax.block_until_ready(spatial_attention_3d(x, up, params))
    assert out.shape == (N, 1, D, H, W)
    assert jnp.allclose(out.astype(jnp.float32), ref, atol=ATOL, rtol=RTOL), \
        "fused path mismatch vs JAX reference"

    # Path B: two-pass S-tiled path (force a small tile to exercise it).
    out2 = jax.block_until_ready(spatial_attention_3d(x, up, params, max_tile_lanes=128))
    assert jnp.allclose(out2.astype(jnp.float32), ref, atol=ATOL, rtol=RTOL), \
        "tiled path mismatch vs JAX reference"

    # Path C: ragged spatial size (S=210 zero-padded to 256) on the tiled path.
    D2, H2, W2 = 5, 6, 7
    x3 = jax.random.normal(k_x, (N, Ci1, D2, H2, W2), jnp.float32)
    up3 = jax.random.normal(k_up, (N, Ci2, D2, H2, W2), jnp.float32)
    ref3 = jax.block_until_ready(reference(x3, up3, params))
    out3 = jax.block_until_ready(
        spatial_attention_3d(x3, up3, params, max_tile_lanes=128))
    assert out3.shape == (N, 1, D2, H2, W2)
    assert jnp.allclose(out3.astype(jnp.float32), ref3, atol=ATOL, rtol=RTOL), \
        "ragged/padded path mismatch vs JAX reference"

    print("KERNEL_OK")
</pallas_src>

<mosaic_0001>
module attributes {stable_mosaic.version = 11 : i64} {
  func.func @fused_kernel(%arg0: i32, %arg1: memref<1x4x512xf32, #tpu.memory_space<vmem>>, %arg2: memref<1x6x512xf32, #tpu.memory_space<vmem>>, %arg3: memref<8x4xf32, #tpu.memory_space<vmem>>, %arg4: memref<8x6xf32, #tpu.memory_space<vmem>>, %arg5: memref<8x1xf32, #tpu.memory_space<vmem>>, %arg6: memref<1x1xf32, #tpu.memory_space<vmem>>, %arg7: memref<1x1x512xf32, #tpu.memory_space<vmem>>) attributes {dimension_semantics = [#tpu.dimension_semantics<parallel>], iteration_bounds = array<i64: 2>, scalar_prefetch = 0 : i64, scratch_operands = 0 : i64, tpu.core_type = #tpu.core_type<tc>, window_params = [{transform_indices = @transform_0, window_bounds = array<i64: 1, 4, 512>}, {transform_indices = @transform_1, window_bounds = array<i64: 1, 6, 512>}, {pipeline_mode = #tpu.pipeline_mode<synchronous>, transform_indices = @transform_2, window_bounds = array<i64: 8, 4>}, {pipeline_mode = #tpu.pipeline_mode<synchronous>, transform_indices = @transform_3, window_bounds = array<i64: 8, 6>}, {pipeline_mode = #tpu.pipeline_mode<synchronous>, transform_indices = @transform_4, window_bounds = array<i64: 8, 1>}, {pipeline_mode = #tpu.pipeline_mode<synchronous>, transform_indices = @transform_5, window_bounds = array<i64: 1, 1>}, {transform_indices = @transform_6, window_bounds = array<i64: 1, 1, 512>}]} {
    %c0 = arith.constant 0 : index
    %c0_0 = arith.constant 0 : index
    %c0_1 = arith.constant 0 : index
    %0 = vector.load %arg1[%c0, %c0_0, %c0_1] : memref<1x4x512xf32, #tpu.memory_space<vmem>>, vector<1x4x512xf32>
    %1 = vector.shape_cast %0 : vector<1x4x512xf32> to vector<4x512xf32>
    %c0_2 = arith.constant 0 : index
    %c0_3 = arith.constant 0 : index
    %c0_4 = arith.constant 0 : index
    %2 = vector.load %arg2[%c0_2, %c0_3, %c0_4] : memref<1x6x512xf32, #tpu.memory_space<vmem>>, vector<1x6x512xf32>
    %3 = vector.shape_cast %2 : vector<1x6x512xf32> to vector<6x512xf32>
    %c0_5 = arith.constant 0 : index
    %c0_6 = arith.constant 0 : index
    %4 = vector.load %arg3[%c0_5, %c0_6] : memref<8x4xf32, #tpu.memory_space<vmem>>, vector<8x4xf32>
    %c0_7 = arith.constant 0 : index
    %c0_8 = arith.constant 0 : index
    %5 = vector.load %arg4[%c0_7, %c0_8] : memref<8x6xf32, #tpu.memory_space<vmem>>, vector<8x6xf32>
    %cst = arith.constant dense<0.000000e+00> : vector<4x4xf32>
    %6 = tpu.matmul %1, %1, %cst {dimension_numbers = #tpu.dot_dimension_numbers<[1], [1], [0], [0], [0, 0, 1, 0], [], []>} : vector<4x512xf32>, vector<4x512xf32>, vector<4x4xf32> -> vector<4x4xf32>
    %cst_9 = arith.constant dense<0.000000e+00> : vector<6x6xf32>
    %7 = tpu.matmul %3, %3, %cst_9 {dimension_numbers = #tpu.dot_dimension_numbers<[1], [1], [0], [0], [0, 0, 1, 0], [], []>} : vector<6x512xf32>, vector<6x512xf32>, vector<6x6xf32> -> vector<6x6xf32>
    %cst_10 = arith.constant dense<0.000000e+00> : vector<4xf32>
    %8 = vector.multi_reduction <add>, %1, %cst_10 [1] : vector<4x512xf32> to vector<4xf32>
    %9 = vector.shape_cast %8 : vector<4xf32> to vector<4x1xf32>
    %cst_11 = arith.constant dense<0.000000e+00> : vector<6xf32>
    %10 = vector.multi_reduction <add>, %3, %cst_11 [1] : vector<6x512xf32> to vector<6xf32>
    %11 = vector.shape_cast %10 : vector<6xf32> to vector<6x1xf32>
    %12 = tpu.concatenate %9, %6 in 1 : vector<4x1xf32>, vector<4x4xf32> -> vector<4x5xf32>
    %cst_12 = arith.constant dense<0.000000e+00> : vector<8x5xf32>
    %13 = tpu.matmul %4, %12, %cst_12 {dimension_numbers = #tpu.dot_dimension_numbers<[1], [0], [0], [1], [0, 0, 1, 1], [], []>} : vector<8x4xf32>, vector<4x5xf32>, vector<8x5xf32> -> vector<8x5xf32>
    %14 = tpu.concatenate %11, %7 in 1 : vector<6x1xf32>, vector<6x6xf32> -> vector<6x7xf32>
    %cst_13 = arith.constant dense<0.000000e+00> : vector<8x7xf32>
    %15 = tpu.matmul %5, %14, %cst_13 {dimension_numbers = #tpu.dot_dimension_numbers<[1], [0], [0], [1], [0, 0, 1, 1], [], []>} : vector<8x6xf32>, vector<6x7xf32>, vector<8x7xf32> -> vector<8x7xf32>
    %16 = vector.extract_strided_slice %13 {offsets = [0, 0], sizes = [8, 1], strides = [1, 1]} : vector<8x5xf32> to vector<8x1xf32>
    %cst_14 = arith.constant 0.001953125 : f32
    %17 = vector.broadcast %cst_14 : f32 to vector<8x1xf32>
    %18 = arith.mulf %16, %17 : vector<8x1xf32>
    %19 = vector.extract_strided_slice %15 {offsets = [0, 0], sizes = [8, 1], strides = [1, 1]} : vector<8x7xf32> to vector<8x1xf32>
    %cst_15 = arith.constant 0.001953125 : f32
    %20 = vector.broadcast %cst_15 : f32 to vector<8x1xf32>
    %21 = arith.mulf %19, %20 : vector<8x1xf32>
    %22 = vector.extract_strided_slice %13 {offsets = [0, 1], sizes = [8, 4], strides = [1, 1]} : vector<8x5xf32> to vector<8x4xf32>
    %23 = arith.mulf %22, %4 : vector<8x4xf32>
    %cst_16 = arith.constant dense<0.000000e+00> : vector<8xf32>
    %24 = vector.multi_reduction <add>, %23, %cst_16 [1] : vector<8x4xf32> to vector<8xf32>
    %25 = vector.shape_cast %24 : vector<8xf32> to vector<8x1xf32>
    %cst_17 = arith.constant 0.001953125 : f32
    %26 = vector.broadcast %cst_17 : f32 to vector<8x1xf32>
    %27 = arith.mulf %25, %26 : vector<8x1xf32>
    %28 = vector.extract_strided_slice %15 {offsets = [0, 1], sizes = [8, 6], strides = [1, 1]} : vector<8x7xf32> to vector<8x6xf32>
    %29 = arith.mulf %28, %5 : vector<8x6xf32>
    %cst_18 = arith.constant dense<0.000000e+00> : vector<8xf32>
    %30 = vector.multi_reduction <add>, %29, %cst_18 [1] : vector<8x6xf32> to vector<8xf32>
    %31 = vector.shape_cast %30 : vector<8xf32> to vector<8x1xf32>
    %cst_19 = arith.constant 0.001953125 : f32
    %32 = vector.broadcast %cst_19 : f32 to vector<8x1xf32>
    %33 = arith.mulf %31, %32 : vector<8x1xf32>
    %34 = arith.mulf %18, %18 : vector<8x1xf32>
    %35 = arith.subf %27, %34 : vector<8x1xf32>
    %cst_20 = arith.constant 0.000000e+00 : f32
    %36 = vector.broadcast %cst_20 : f32 to vector<8x1xf32>
    %37 = arith.maximumf %35, %36 : vector<8x1xf32>
    %cst_21 = arith.constant 9.99999974E-6 : f32
    %38 = vector.broadcast %cst_21 : f32 to vector<8x1xf32>
    %39 = arith.addf %37, %38 : vector<8x1xf32>
    %40 = math.rsqrt %39 : vector<8x1xf32>
    %41 = arith.mulf %21, %21 : vector<8x1xf32>
    %42 = arith.subf %33, %41 : vector<8x1xf32>
    %cst_22 = arith.constant 0.000000e+00 : f32
    %43 = vector.broadcast %cst_22 : f32 to vector<8x1xf32>
    %44 = arith.maximumf %42, %43 : vector<8x1xf32>
    %cst_23 = arith.constant 9.99999974E-6 : f32
    %45 = vector.broadcast %cst_23 : f32 to vector<8x1xf32>
    %46 = arith.addf %44, %45 : vector<8x1xf32>
    %47 = math.rsqrt %46 : vector<8x1xf32>
    %48 = vector.broadcast %40 : vector<8x1xf32> to vector<8x4xf32>
    %49 = arith.mulf %48, %4 : vector<8x4xf32>
    %cst_24 = arith.constant dense<0.000000e+00> : vector<8x512xf32>
    %50 = tpu.matmul %49, %1, %cst_24 {dimension_numbers = #tpu.dot_dimension_numbers<[1], [0], [0], [1], [0, 0, 1, 1], [], []>} : vector<8x4xf32>, vector<4x512xf32>, vector<8x512xf32> -> vector<8x512xf32>
    %51 = vector.broadcast %47 : vector<8x1xf32> to vector<8x6xf32>
    %52 = arith.mulf %51, %5 : vector<8x6xf32>
    %cst_25 = arith.constant dense<0.000000e+00> : vector<8x512xf32>
    %53 = tpu.matmul %52, %3, %cst_25 {dimension_numbers = #tpu.dot_dimension_numbers<[1], [0], [0], [1], [0, 0, 1, 1], [], []>} : vector<8x6xf32>, vector<6x512xf32>, vector<8x512xf32> -> vector<8x512xf32>
    %54 = arith.addf %50, %53 : vector<8x512xf32>
    %55 = arith.mulf %18, %40 : vector<8x1xf32>
    %56 = arith.mulf %21, %47 : vector<8x1xf32>
    %57 = arith.addf %55, %56 : vector<8x1xf32>
    %58 = vector.broadcast %57 : vector<8x1xf32> to vector<8x512xf32>
    %59 = arith.subf %54, %58 : vector<8x512xf32>
    %cst_26 = arith.constant 0.000000e+00 : f32
    %60 = vector.broadcast %cst_26 : f32 to vector<8x512xf32>
    %61 = arith.maximumf %59, %60 : vector<8x512xf32>
    %c0_27 = arith.constant 0 : index
    %c0_28 = arith.constant 0 : index
    %62 = vector.load %arg5[%c0_27, %c0_28] : memref<8x1xf32, #tpu.memory_space<vmem>>, vector<8x1xf32>
    %63 = vector.broadcast %62 : vector<8x1xf32> to vector<8x512xf32>
    %64 = arith.mulf %61, %63 : vector<8x512xf32>
    %cst_29 = arith.constant dense<0.000000e+00> : vector<512xf32>
    %65 = vector.multi_reduction <add>, %64, %cst_29 [0] : vector<8x512xf32> to vector<512xf32>
    %66 = vector.shape_cast %65 : vector<512xf32> to vector<1x512xf32>
    %c0_30 = arith.constant 0 : index
    %c0_31 = arith.constant 0 : index
    %67 = vector.load %arg6[%c0_30, %c0_31] : memref<1x1xf32, #tpu.memory_space<vmem>>, vector<1x1xf32>
    %68 = vector.broadcast %67 : vector<1x1xf32> to vector<1x512xf32>
    %69 = arith.addf %66, %68 : vector<1x512xf32>
    %70 = arith.negf %69 : vector<1x512xf32>
    %71 = math.exp %70 : vector<1x512xf32>
    %cst_32 = arith.constant 1.000000e+00 : f32
    %72 = vector.broadcast %cst_32 : f32 to vector<1x512xf32>
    %73 = arith.addf %72, %71 : vector<1x512xf32>
    %74 = arith.divf %72, %73 : vector<1x512xf32>
    %c0_33 = arith.constant 0 : index
    %c0_34 = arith.constant 0 : index
    %c0_35 = arith.constant 0 : index
    %75 = vector.load %arg7[%c0_33, %c0_34, %c0_35] : memref<1x1x512xf32, #tpu.memory_space<vmem>>, vector<1x1x512xf32>
    %76 = vector.shape_cast %75 : vector<1x1x512xf32> to vector<1x512xf32>
    %77 = vector.shape_cast %74 : vector<1x512xf32> to vector<1x1x512xf32>
    tpu.vector_store %arg7[%c0_33, %c0_34, %c0_35], %77 {strides = array<i32>} : memref<1x1x512xf32, #tpu.memory_space<vmem>>, vector<1x1x512xf32>,
    return
  }
  func.func @transform_0(%arg0: i32) -> (i32, i32, i32) {
    %c0_i32 = arith.constant 0 : i32
    %c0_i32_0 = arith.constant 0 : i32
    %c0_i32_1 = arith.constant 0 : i32
    return %arg0, %c0_i32, %c0_i32_0 : i32, i32, i32
  }
  func.func @transform_1(%arg0: i32) -> (i32, i32, i32) {
    %c0_i32 = arith.constant 0 : i32
    %c0_i32_0 = arith.constant 0 : i32
    %c0_i32_1 = arith.constant 0 : i32
    return %arg0, %c0_i32, %c0_i32_0 : i32, i32, i32
  }
  func.func @transform_2(%arg0: i32) -> (i32, i32) {
    %c0_i32 = arith.constant 0 : i32
    %c0_i32_0 = arith.constant 0 : i32
    %c0_i32_1 = arith.constant 0 : i32
    return %c0_i32, %c0_i32_0 : i32, i32
  }
  func.func @transform_3(%arg0: i32) -> (i32, i32) {
    %c0_i32 = arith.constant 0 : i32
    %c0_i32_0 = arith.constant 0 : i32
    %c0_i32_1 = arith.constant 0 : i32
    return %c0_i32, %c0_i32_0 : i32, i32
  }
  func.func @transform_4(%arg0: i32) -> (i32, i32) {
    %c0_i32 = arith.constant 0 : i32
    %c0_i32_0 = arith.constant 0 : i32
    %c0_i32_1 = arith.constant 0 : i32
    return %c0_i32, %c0_i32_0 : i32, i32
  }
  func.func @transform_5(%arg0: i32) -> (i32, i32) {
    %c0_i32 = arith.constant 0 : i32
    %c0_i32_0 = arith.constant 0 : i32
    %c0_i32_1 = arith.constant 0 : i32
    return %c0_i32, %c0_i32_0 : i32, i32
  }
  func.func @transform_6(%arg0: i32) -> (i32, i32, i32) {
    %c0_i32 = arith.constant 0 : i32
    %c0_i32_0 = arith.constant 0 : i32
    %c0_i32_1 = arith.constant 0 : i32
    return %arg0, %c0_i32, %c0_i32_0 : i32, i32, i32
  }
}

</mosaic_0001>

<bundles_post_ra>
// kernel: tpu_custom_call.1
= control target key start
LH: loop header
LB: loop body
LE: loop exit
PB: predicated region body
PF: predicated region fallthrough
CT: control target
= control target key end

     0   :  { %s1735_s0 = inlined_call_operand.vmem [shape: f32[2,4,512], index: 0, kind: input, shape index: {}]   ;;  %s1736_s1 = inlined_call_operand.vmem [shape: f32[2,6,512], index: 1, kind: input, shape index: {}]   ;;  %s1737_s2 = inlined_call_operand.vmem [shape: f32[8,4], index: 2, kind: input, shape index: {}]   ;;  %s1738_s3 = inlined_call_operand.vmem [shape: f32[8,6], index: 3, kind: input, shape index: {}]   ;;  %s1739_s4 = inlined_call_operand.vmem [shape: f32[8,1], index: 4, kind: input, shape index: {}]   ;;  %s1740_s5 = inlined_call_operand.<no memory space> [shape: f32[1,1], index: 5, kind: input, shape index: {}]   ;;  %s1741_s6 = inlined_call_operand.hbm [shape: f32[2,1,512], index: 6, kind: output, shape index: {}]  }
   0x1   :  { %v11_v0 = vstv %s1740_s5 }
   0x2   :  { %12 = vst [vmem:[#allocation2] sm:$0x1] %v11_v0 }
   0x3   :  { %13 = vsyncpa [#allocation4], 0 }
   0x4   :  { %15 = vsyncpa [#allocation4 + $0x1], 0  ;;  %s1544_s23 = smov 0   ;;  %s1546_s24 = smov 0  }
   0x5   :  { %s1548_s25 = smov 0   ;;  %s1550_s26 = smov 0  }
   0x6 LB: > { %s1565_s5 = sadd.s32 4294967295, %s1497_s26   ;;  %s1317_s27 = sadd.s32 4294967294, %s1497_s26   ;;  %s1497_s26 = sphi %s1550_s26, %s1747_s26   ;;  %s1493_s25 = sphi %s1548_s25, %s1746_s25   ;;  %s1489_s24 = sphi %s1546_s24, %s1745_s24   ;;  %s1485_s23 = sphi %s1544_s23, %s1744_s23  }
   0x7   : > { %s1569_s28 = sadd.s32 1, %s1497_s26   ;;  %s164_s29 = sadd.s32 1, %s1493_s25 }
   0x8   : > { %s161_s30 = ssub.s32 %s1497_s26, %s1569_s28  ;;  %p174_p0 = scmp.ne.s32.totalorder %s1493_s25, %s1489_s24 }
   0x9   : > { %p162_p1 = scmp.eq.s32.totalorder %s161_s30, 0  ;;  %p175_p2 = scmp.eq.s32.totalorder %s1565_s5, 1 }
   0xa   : > { %p180_p3 = scmp.ne.s32.totalorder %s1489_s24, %s1485_s23  ;;  %p181_p4 = scmp.eq.s32.totalorder %s1317_s27, 1 }
   0xb   : > { %s1580_s7 = scalar_select %p162_p1, %s1493_s25, %s164_s29  }
   0xc   : > { %p1582_p5 = por %p175_p2, %p174_p0  ;;  %p1586_p6 = por %p181_p4, %p180_p3 }
   0xd   : > { %p1320_p7 = scmp.ge.s32.totalorder %s1497_s26, 1  ;;  %p227_p8 = scmp.lt.s32.totalorder %s1497_s26, 3 }
   0xf   : > { %p228_p9 = pnand %p1320_p7, %p227_p8 }
  0x10   : > { %p262_p10 = scmp.lt.s32.totalorder (!%p228_p9), %s1565_s5, 1  ;;  %s1501_s21 = smov (!%p228_p9), 1  }
  0x11   : > { %231 = sbr.rel (%p228_p9) target bundleno = 1221 (0x4c5), region = 44  ;;  %s1502_s29 = smov (!%p228_p9), 127  }
  0x12   : > { %s1353_s13 = sshll.u32 (!%p228_p9), %s1565_s5, 6 }
  0x16   : > { %s263_s10 = scalar_select %p262_p10, %s1565_s5, 1  ;;  %vm576_vm0 = vcmask 1045504   ;;  %vm566_vm1 = vcmask 1043456   ;;  %v1499_v23 = vmov 0.0   ;;  %vm1500_vm2 = vmmov 0   ;;  %v1653_v24 = vld [vmem:[%s1738_s3] sm:$0xff] }
  0x17   : > { %v1660_v35 = vld [vmem:[%s1737_s2] sm:$0xff]  ;;  %vm590_vm3 = vcmask 7168   ;;  %vm674_vm4 = vcmask 48128   ;;  %vm592_vm5 = vcmask 31744   ;;  %v1503_v54 = vmov 0  }
  0x18   : > { %s1351_s11 = sshll.u32 %s263_s10, 4  ;;  %s1352_s12 = sshll.u32 %s263_s10, 5  ;;  %1413 = vset.pattern.permute.xlu1 %v1503_v54  ;;  %1414 = vset.pattern.permute.xlu0 %v1503_v54 }
  0x19   : > { %s266_s15 = scalar_lea.vmem %s1735_s0, %s1351_s11  ;;  %s271_s18 = scalar_lea.vmem %s1736_s1, %s1352_s12 }
  0x1a   : > { %v1600_v1 = vld [vmem:[%s266_s15] sm:$0xff]  ;;  %v1602_v2 = vld [vmem:[%s266_s15 + $0x8] sm:$0xff]  ;;  %v1616_v7 = vld [vmem:[%s271_s18 + $0x10] sm:$0x3f]  ;;  %s259_s11 = sand.u32 1, %s1489_s24  }
  0x1b   : > { %v1606_v3 = vcombine.high %v1600_v1, %v1600_v1  ;;  %v1610_v4 = vcombine.high %v1602_v2, %v1602_v2  ;;  %v1612_v5 = vld [vmem:[%s271_s18 + $0x8] sm:$0x3f]  ;;  %v1614_v6 = vld [vmem:[%s271_s18] sm:$0x3f]  ;;  %v580_v10 = vsel %vm576_vm0, %v1616_v7, 0.0  ;;  %v567_v13 = vsel %vm566_vm1, %v1600_v1, 0.0 }
  0x1c   : > { %v577_v8 = vsel %vm576_vm0, %v1614_v6, 0.0  ;;  %v578_v9 = vsel %vm576_vm0, %v1612_v5, 0.0  ;;  %v277_v11 = vld [vmem:[%s271_s18 + $0x18] sm:$0x3f]  ;;  %v570_v15 = vsel %vm566_vm1, %v1602_v2, 0.0  ;;  %s1321_s12 = sshll.u32 %s259_s11, 2  ;;  %s1244_s18 = scalar_lea.hbm %s1741_s6, %s1353_s13 }
  0x1d   : > { %316 = vmatprep.subr.mxu0 %v1606_v3  ;;  %386 = vmatprep.subr.mxu1 %v1610_v4  ;;  %v579_v12 = vadd.f32 %v578_v9, %v577_v8  ;;  %v568_v14 = vsel %vm566_vm1, %v1606_v3, 0.0  ;;  %v582_v16 = vsel %vm576_vm0, %v277_v11, 0.0  ;;  %v572_v21 = vsel %vm566_vm1, %v1610_v4, 0.0  ;;  %s261_s14 = scalar_lea.vmem [#allocation3], %s1321_s12  ;;  %s1232_s19 = scalar_lea.sflag [#allocation4], %s259_s11 }
  0x1e   : > { %317 = vmatpush1.xpose.msra.mxu0 %v1600_v1  ;;  %387 = vmatpush1.xpose.msra.mxu1 %v1602_v2  ;;  %v569_v17 = vadd.f32 %v568_v14, %v567_v13  ;;  %v1159_v13 = vld [vmem:[#allocation2] sm:$0x1]  ;;  %s1246_s15 = sshll.u32 %s261_s14, 4  ;;  %s1247_s15 = int_to_ptr.vmem [resolvable:$true] %s1246_s15 }
  0x1f   : > { %350 = vmatprep.mubr.f32.mxu0 %v1606_v3  ;;  %420 = vmatprep.mubr.f32.mxu1 %v1610_v4  ;;  %v581_v18 = vadd.f32 %v580_v10, %v579_v12  ;;  %v1125_v12 = vld [vmem:[%s1739_s4] sm:$0xff]  ;;  %s1437_s20 = scalar_lea.vmem %s1247_s15, 64 }
  0x20   : > { %456 = vmatprep.subr.mxu0 %v1612_v5  ;;  %526 = vmatprep.subr.mxu1 %v277_v11  ;;  %v571_v19 = vadd.f32 %v570_v15, %v569_v17  ;;  %p1438_p11 = scmp.ne.s32.totalorder %s1247_s15, %s1437_s20 }
  0x21   : > { %351 = vmatmul.mubr.f32.vlgmr.msra.gmra.mxu0 %v1600_v1  ;;  %421 = vmatmul.mubr.f32.vlgmr.msra.gmra.mxu1 %v1602_v2  ;;  %v583_v20 = vadd.f32 %v582_v16, %v581_v18 }
  0x22   : > { %457 = vmatpush1.xpose.msra.mxu0 %v1614_v6  ;;  %527 = vmatpush1.xpose.msra.mxu1 %v1616_v7  ;;  %v573_v22 = vadd.f32 %v572_v21, %v571_v19  ;;  %p1439_p12 = pnand %p1438_p11, %p1582_p5 }
  0x23   : > { %490 = vmatprep.mubr.f32.mxu0 %v1612_v5  ;;  %560 = vmatprep.mubr.f32.mxu1 %v277_v11 }
  0x24   : > { %584 = vadd.xlane.f32.xlu0 %v583_v20  ;;  %1363 = vmatprep.subr.mxu1 %v1499_v23  ;;  %p1440_p13 = pneg %p1439_p12 }
  0x25   : > { %491 = vmatmul.mubr.f32.vlgmr.msra.gmra.mxu0 %v1614_v6  ;;  %561 = vmatmul.mubr.f32.vlgmr.msra.gmra.mxu1 %v1616_v7 }
  0x26   : > { %1358 = vmatprep.subr.mxu0 %v1499_v23  ;;  %1365 = vmatprep.mubr.msk.f32.mxu1 %vm1500_vm2, %v1499_v23 }
  0x27   : > { %1360 = vmatprep.mubr.msk.f32.mxu0 %vm1500_vm2, %v1499_v23 }
  0x28   : > { %574 = vadd.xlane.f32.xlu0 %v573_v22 }
  0x3e   : > { %765 = vrot.lane.b32.xlu0 %v1653_v24, %s1501_s21 }
  0xad   : > { %v585_v36 = vpop.xlane.xlu0 %584 }
  0xb1   : > { %v575_v39 = vpop.xlane.xlu0 %574 }
  0xb5   : > { %v766_v42 = vpop.permute.xlu0 %765 }
  0xe1   : > { %v352_v25 = vpop.f32.mrf.mxu0  ;;  %v422_v26 = vpop.f32.mrf.mxu1 }
  0xe2   : > { %v423_v34 = vadd.f32 %v422_v26, %v352_v25 }
  0xe3   : > { %v354_v27 = vpop.f32.mrf.mxu0  ;;  %v424_v28 = vpop.f32.mrf.mxu1 }
  0xe5   : > { %v492_v29 = vpop.f32.mrf.mxu0  ;;  %v562_v30 = vpop.f32.mrf.mxu1 }
  0xe6   : > { %v563_v31 = vadd.f32 %v562_v30, %v492_v29 }
  0xe7   : > { %v494_v32 = vpop.f32.mrf.mxu0  ;;  %v564_v33 = vpop.f32.mrf.mxu1 }
  0xe8   : > { %670 = vrot.lane.b32.xlu1 %v563_v31, %s1501_s21 }
  0xec   : > { %587 = vrot.lane.b32.xlu1 %v423_v34, %s1501_s21 }
  0xf0   : > { %753 = vrot.lane.b32.xlu1 %v1660_v35, %s1501_s21  ;;  %s1505_s21 = smov [#allocation3]  }
  0xf1   : > { %s1441_s5 = sshll.u32 %s1505_s21, 4  ;;  %s1442_s5 = int_to_ptr.vmem [resolvable:$false] %s1441_s5 }
  0xf2   : > { %s1443_s22 = scalar_lea.vmem %s1442_s5, 128  ;;  %p1444_p0 = scmp.lt.s32.totalorder %s1247_s15, %s1442_s5 }
  0xf3   : > { %p1445_p1 = scmp.lt.s32.totalorder %s1443_s22, %s1437_s20 }
  0xf5   : > { %p1446_p2 = por %p1445_p1, %p1444_p0 }
  0xf7   : > { %p1447_p3 = pnand %p1446_p2, %p1440_p13 }
 0x15a   : > { %v671_v37 = vpop.permute.xlu1 %670 }
 0x15b   : > { %v673_v38 = vsel %vm590_vm3, %v585_v36, %v671_v37  ;;  %v1165_v36 = vlaneseq }
 0x15c   : > { %1364 = vmatpush3.msk.msra.mxu1 %vm576_vm0, %v673_v38 }
 0x15d   : > { %1366 = vmatmul.mubr.msk.f32.vlgmr.msra.gmra.mxu1 %vm674_vm4, %v1653_v24  ;;  %1333 = vmatprep.subr.msk.mxu1 %vm576_vm0, %v277_v11  ;;  %vm1228_vm6 = vcmp.lt.s32.totalorder %v1165_v36, 512 }
 0x15e   : > { %v588_v40 = vpop.permute.xlu1 %587  ;;  %1334 = vmatpush1.msk.msra.mxu1 %vm576_vm0, %v1616_v7  ;;  %949 = vmatprep.mubr.f32.mxu1 %v1499_v23 }
 0x15f   : > { %v591_v41 = vsel %vm590_vm3, %v575_v39, %v588_v40  ;;  %1339 = vmatprep.subr.msk.mxu1 %vm566_vm1, %v1610_v4 }
 0x160   : > { %1359 = vmatpush3.msk.msra.mxu0 %vm566_vm1, %v591_v41 }
 0x161   : > { %1361 = vmatmul.mubr.msk.f32.vlgmr.msra.gmra.mxu0 %vm592_vm5, %v1660_v35  ;;  %1330 = vmatprep.subr.msk.mxu0 %vm576_vm0, %v1612_v5 }
 0x162   : > { %1331 = vmatpush1.msk.msra.mxu0 %vm576_vm0, %v1614_v6  ;;  %878 = vmatprep.mubr.f32.mxu0 %v1499_v23  ;;  %v754_v46 = vpop.permute.xlu1 %753 }
 0x163   : > { %1336 = vmatprep.subr.msk.mxu0 %vm566_vm1, %v1606_v3 }
 0x21d   : > { %v747_v43 = vpop.f32.mrf.mxu1 }
 0x21e   : > { %v768_v44 = vmul.f32 %v766_v42, %v747_v43  ;;  %v752_v55 = vmul.f32 0.001953125, %v747_v43 }
 0x21f   : > { %v1367_v45 = vpop.f32.mrf.mxu1 }
 0x220   : > { %770 = vrot.lane.b32.xlu1 %v768_v44, %s1502_s29  ;;  %v782_v57 = vmul.f32 %v752_v55, %v752_v55  ;;  %v1166_v45 = vshrl.u32 %v1165_v36, 7 }
 0x221   : > { %v665_v47 = vpop.f32.mrf.mxu0 }
 0x222   : > { %v756_v48 = vmul.f32 %v754_v46, %v665_v47  ;;  %v751_v58 = vmul.f32 0.001953125, %v665_v47  ;;  %v1167_v54 = vsub.s32 0, %v1166_v45 }
 0x223   : > { %v1362_v49 = vpop.f32.mrf.mxu0 }
 0x224   : > { %758 = vrot.lane.b32.xlu1 %v756_v48, %s1502_s29  ;;  %v777_v62 = vmul.f32 %v751_v58, %v751_v58 }
 0x292   : > { %v771_v50 = vpop.permute.xlu1 %770 }
 0x293   : > { %v773_v51 = vsel %vm674_vm4, %v771_v50, 0.0 }
 0x294   : > { %774 = vadd.xlane.f32.xlu1 %v773_v51 }
 0x296   : > { %v759_v52 = vpop.permute.xlu1 %758 }
 0x297   : > { %v761_v53 = vsel %vm592_vm5, %v759_v52, 0.0 }
 0x298   : > { %762 = vadd.xlane.f32.xlu0 %v761_v53 }
 0x31d   : > { %v775_v56 = vpop.xlane.xlu1 %774 }
 0x31e   : > { %v776_v59 = vmul.f32 0.001953125, %v775_v56 }
 0x320   : > { %v783_v60 = vsub.f32 %v776_v59, %v782_v57 }
 0x321   : > { %v763_v61 = vpop.xlane.xlu0 %762 }
 0x322   : > { %v784_v63 = vmax.f32 %v783_v60, 0.0  ;;  %v764_v0 = vmul.f32 0.001953125, %v763_v61 }
 0x324   : > { %v785_v3 = vadd.f32 1e-05, %v784_v63  ;;  %v778_v4 = vsub.f32 %v764_v0, %v777_v62 }
 0x326   : > { %1417 = vrsqrt.f32 %v785_v3  ;;  %v779_v5 = vmax.f32 %v778_v4, 0.0 }
 0x328   : > { %v780_v6 = vadd.f32 1e-05, %v779_v5 }
 0x32a   : > { %1419 = vrsqrt.f32 %v780_v6 }
 0x333   : > { %v1418_v7 = vpop.eup %1417 }
 0x334   : > { %795 = vperm.xlu1 %1413, %v1418_v7   ;;  %v1110_v10 = vmul.f32 %v1418_v7, %v752_v55 }
 0x337   : > { %v1420_v8 = vpop.eup %1419 }
 0x338   : > { %789 = vperm.xlu0 %1414, %v1420_v8   ;;  %v1109_v9 = vmul.f32 %v1420_v8, %v751_v58 }
 0x33a   : > { %v1111_v11 = vadd.f32 %v1110_v10, %v1109_v9 }
 0x33c   : > { %1114 = vperm.xlu1 %1413, %v1111_v11  }
 0x340   : > { %1128 = vperm.xlu1 %1413, %v1125_v12  }
 0x344   : > { %1162 = vperm.xlu1 %1413, %v1159_v13  }
 0x3af   : > { %v796_v14 = vpop.permute.xlu1 %795 }
 0x3b0   : > { %v798_v15 = vmul.f32 %v796_v14, %v1653_v24 }
 0x3b2   : > { %1332 = vmatmul.mubr.msk.f32.vlgmr.msra.gmra.mxu0 %vm674_vm4, %v798_v15  ;;  %1335 = vmatmul.mubr.msk.f32.vlgmr.msra.gmra.mxu1 %vm674_vm4, %v798_v15 }
 0x3b3   : > { %v790_v16 = vpop.permute.xlu0 %789  ;;  %1337 = vmatpush1.msk.msra.mxu0 %vm566_vm1, %v1600_v1  ;;  %1031 = vmatprep.mubr.f32.mxu0 %v1499_v23 }
 0x3b4   : > { %v792_v17 = vmul.f32 %v790_v16, %v1660_v35  ;;  %1340 = vmatpush1.msk.msra.mxu1 %vm566_vm1, %v1602_v2  ;;  %1102 = vmatprep.mubr.f32.mxu1 %v1499_v23 }
 0x3b6   : > { %1338 = vmatmul.mubr.msk.f32.vlgmr.msra.gmra.mxu0 %vm592_vm5, %v792_v17  ;;  %1341 = vmatmul.mubr.msk.f32.vlgmr.msra.gmra.mxu1 %vm592_vm5, %v792_v17 }
 0x3b7   : > { %v1115_v22 = vpop.permute.xlu1 %1114 }
 0x3bb   : > { %v1129_v35 = vpop.permute.xlu1 %1128 }
 0x3bf   : > { %v1163_v55 = vpop.permute.xlu1 %1162 }
 0x3c0   : > { %v1168_v0 = vrot.slane %v1163_v55, %v1167_v54 }
 0x472   : > { %v880_v18 = vpop.f32.mrf.mxu0  ;;  %v951_v19 = vpop.f32.mrf.mxu1 }
 0x474   : > { %v882_v20 = vpop.f32.mrf.mxu0  ;;  %v953_v21 = vpop.f32.mrf.mxu1 }
 0x476   : > { %v1033_v24 = vpop.f32.mrf.mxu0  ;;  %v1104_v1 = vpop.f32.mrf.mxu1 }
 0x477   : > { %v1034_v25 = vadd.f32 %v1033_v24, %v880_v18  ;;  %v1105_v26 = vadd.f32 %v1104_v1, %v951_v19 }
 0x478   : > { %v1035_v27 = vpop.f32.mrf.mxu0  ;;  %v1106_v28 = vpop.f32.mrf.mxu1 }
 0x479   : > { %v1117_v29 = vsub.f32 %v1034_v25, %v1115_v22  ;;  %v1119_v30 = vsub.f32 %v1105_v26, %v1115_v22  ;;  %v1036_v2 = vadd.f32 %v1035_v27, %v882_v20  ;;  %v1107_v31 = vadd.f32 %v1106_v28, %v953_v21 }
 0x47a   : > { %v1504_v25 = vmov 1966171168  }
 0x47b   : > { %v1121_v23 = vmax.f32 %v1117_v29, 0.0  ;;  %v1123_v32 = vmax.f32 %v1119_v30, 0.0  ;;  %v1118_v33 = vsub.f32 %v1036_v2, %v1115_v22  ;;  %v1120_v34 = vsub.f32 %v1107_v31, %v1115_v22 }
 0x47c   : > { %v1204_v26 = vunpack.c.l.s4 %v1504_v25 }
 0x47d   : > { %v1131_v37 = vmul.f32 %v1129_v35, %v1121_v23  ;;  %v1133_v38 = vmul.f32 %v1129_v35, %v1123_v32  ;;  %v1122_v39 = vmax.f32 %v1118_v33, 0.0  ;;  %v1124_v40 = vmax.f32 %v1120_v34, 0.0 }
 0x47e   : > { %v1205_v27 = vunpack.c.0.s8 %v1204_v26 }
 0x47f   : > { %v1135_v41 = vrot.slane %v1131_v37, 4  ;;  %v1147_v42 = vrot.slane %v1133_v38, 4  ;;  %v1132_v43 = vmul.f32 %v1129_v35, %v1122_v39  ;;  %v1134_v44 = vmul.f32 %v1129_v35, %v1124_v40 }
 0x480   : > { %v1208_v30 = vsub.s32 %v1205_v27, %v1166_v45 }
 0x481   : > { %v1136_v46 = vadd.f32 %v1135_v41, %v1131_v37  ;;  %v1148_v47 = vadd.f32 %v1147_v42, %v1133_v38  ;;  %v1141_v48 = vrot.slane %v1132_v43, 4  ;;  %v1153_v49 = vrot.slane %v1134_v44, 4 }
 0x483   : > { %v1137_v50 = vrot.slane %v1136_v46, 2  ;;  %v1149_v51 = vrot.slane %v1148_v47, 2  ;;  %v1142_v52 = vadd.f32 %v1141_v48, %v1132_v43  ;;  %v1154_v53 = vadd.f32 %v1153_v49, %v1134_v44 }
 0x485   : > { %v1138_v56 = vadd.f32 %v1137_v50, %v1136_v46  ;;  %v1150_v57 = vadd.f32 %v1149_v51, %v1148_v47  ;;  %v1143_v58 = vrot.slane %v1142_v52, 2  ;;  %v1155_v59 = vrot.slane %v1154_v53, 2 }
 0x487   : > { %v1139_v60 = vrot.slane %v1138_v56, 1  ;;  %v1151_v61 = vrot.slane %v1150_v57, 1  ;;  %v1144_v62 = vadd.f32 %v1143_v58, %v1142_v52  ;;  %v1156_v63 = vadd.f32 %v1155_v59, %v1154_v53 }
 0x489   : > { %v1140_v3 = vadd.f32 %v1139_v60, %v1138_v56  ;;  %v1152_v4 = vadd.f32 %v1151_v61, %v1150_v57  ;;  %v1145_v5 = vrot.slane %v1144_v62, 1  ;;  %v1157_v6 = vrot.slane %v1156_v63, 1 }
 0x48b   : > { %v1169_v7 = vadd.f32 %v1168_v0, %v1140_v3  ;;  %v1171_v8 = vadd.f32 %v1168_v0, %v1152_v4  ;;  %v1146_v9 = vadd.f32 %v1145_v5, %v1144_v62  ;;  %v1158_v10 = vadd.f32 %v1157_v6, %v1156_v63 }
 0x48d   : > { %v1342_v11 = vmul.f32 -1.442695, %v1169_v7  ;;  %v1344_v12 = vmul.f32 -1.442695, %v1171_v8  ;;  %v1170_v13 = vadd.f32 %v1168_v0, %v1146_v9  ;;  %v1172_v14 = vadd.f32 %v1168_v0, %v1158_v10 }
 0x48f   : > { %1421 = vpow2.f32 %v1342_v11  ;;  %v1343_v15 = vmul.f32 -1.442695, %v1170_v13  ;;  %v1345_v16 = vmul.f32 -1.442695, %v1172_v14 }
 0x490   : > { %1423 = vpow2.f32 %v1344_v12 }
 0x491   : > { %1425 = vpow2.f32 %v1343_v15 }
 0x492   : > { %1427 = vpow2.f32 %v1345_v16 }
 0x49c   : > { %v1422_v17 = vpop.eup %1421 }
 0x49d   : > { %v1424_v18 = vpop.eup %1423  ;;  %v1185_v19 = vadd.f32 1.0, %v1422_v17 }
 0x49e   : > { %v1426_v20 = vpop.eup %1425  ;;  %v1187_v21 = vadd.f32 1.0, %v1424_v18 }
 0x49f   : > { %v1428_v22 = vpop.eup %1427  ;;  %1429 = vrcp.f32 %v1185_v19  ;;  %v1186_v24 = vadd.f32 1.0, %v1426_v20 }
 0x4a0   : > { %1431 = vrcp.f32 %v1187_v21  ;;  %v1188_v1 = vadd.f32 1.0, %v1428_v22 }
 0x4a1   : > { %1433 = vrcp.f32 %v1186_v24 }
 0x4a2   : > { %1435 = vrcp.f32 %v1188_v1 }
 0x4ac   : > { %v1430_v28 = vpop.eup %1429 }
 0x4ad   : > { %v1432_v29 = vpop.eup %1431 }
 0x4ae   : > { %v1434_v2 = vpop.eup %1433 }
 0x4af   : > { %v1436_v31 = vpop.eup %1435  ;;  %v1201_v23 = vcombine.low %v1430_v28, %v1434_v2 }
 0x4b0   : > { %v1202_v32 = vcombine.low %v1432_v29, %v1436_v31 }
 0x4b1   : > { %v1209_v33 = vrot.slane %v1201_v23, %v1208_v30 }
 0x4b2   : > { %v1216_v34 = vrot.slane %v1202_v32, %v1208_v30 }
 0x4b4   : > { %v1217_v35 = vcombine.low %v1209_v33, %v1216_v34 }
 0x4b6   : > { %v1224_v37 = vrot.slane %v1217_v35, %v1208_v30 }
 0x4b8   : > { %1230 = vst.msk [vmem:[%s261_s14] sm:$0xf] %vm1228_vm6, %v1224_v37 }
 0x4b9   : > { %1450 = shalt.err (!%p1447_p3)
}
 0x4ba   : > { %s1451_s27 = scalar_lea.hbm %s1244_s18, 64  ;;  %s1455_s10 = scalar_lea.hbm %s1741_s6, 128 }
 0x4bb   : > { %p1452_p4 = scmp.ne.s32.totalorder %s1244_s18, %s1451_s27  ;;  %p1456_p9 = scmp.lt.s32.totalorder %s1244_s18, %s1741_s6 }
 0x4bc   : > { %p1457_p10 = scmp.lt.s32.totalorder %s1455_s10, %s1451_s27 }
 0x4bd   : > { %p1453_p7 = pnand %p1452_p4, %p1582_p5 }
 0x4be   : > { %p1458_p11 = por %p1457_p10, %p1456_p9 }
 0x4bf   : > { %p1454_p8 = pneg %p1453_p7 }
 0x4c1   : > { %p1459_p12 = pnand %p1458_p11, %p1454_p8 }
 0x4c3   : > { %1462 = shalt.err (!%p1459_p12)
}
 0x4c4   : > { %1368 = dma.vmem_to_hbm [thread:$0]  (%p1582_p5), %s1247_s15, 64, %s1244_s18, %s1232_s19  }
 0x4c5 PF: > { %p1374_p13 = scmp.ge.s32.totalorder %s1497_s26, 2  ;;  %s1258_s13 = sand.u32 1, %s1485_s23  }
 0x4c6   : > { %s1259_s14 = scalar_lea.sflag [#allocation4], %s1258_s13 }
 0x4c7   : > { %p1371_p0 = pnand %p1374_p13, %p1586_p6 }
 0x4c9   : > { %p1372_p1 = pneg %p1371_p0 }
 0x4cb   : > { %1480 = dma.done.wait (%p1372_p1), %s1259_s14, 64  }
 0x4cc   : > { %1482 = vsyncadd (%p1372_p1), %s1259_s14, 4294967232  ;;  %p18_p2 = scmp.ge.s32.totalorder %s1569_s28, 4   ;;  %s1744_s23 = smov %s1489_s24 }
 0x4cd   : > { %s1745_s24 = smov %s1493_s25  ;;  %s1746_s25 = smov %s1580_s7 }
 0x4ce   : > { %s1747_s26 = smov %s1569_s28  ;;  %20 = sbr.rel (!%p18_p2) target bundleno = 6 (0x6), region = 82 }
 0x4d3   :  { %1264 = vsyncpa [#allocation4], 1 }
 0x4d4   :  { %1266 = vsyncpa [#allocation4 + $0x1], 1 }

</bundles_post_ra>
